<compile_context>
chip_gen: v7x
topology: tpu7x:2x2x1
jax: 0.10.0
libtpu: 0.0.40
codegen_flags: <defaults>
</compile_context>

<pallas_src>
import functools

import jax
import jax.numpy as jnp
from jax import lax
from jax.experimental import pallas as pl
from jax.experimental.pallas import tpu as pltpu

_LANE = 128


def _round_up(x, m):
    return ((x + m - 1) // m) * m


def _pad_to(arr, shape):
    pads = [(0, t - s) for s, t in zip(arr.shape, shape)]
    if all(p == (0, 0) for p in pads):
        return arr
    return jnp.pad(arr, pads)


def _pick_row_tile(n_pad):
    # Largest of 512/384/256/128 that divides n_pad (n_pad is a multiple of 128).
    if n_pad <= 512:
        return n_pad
    for t in (512, 384, 256, 128):
        if n_pad % t == 0:
            return t
    return 128


def _vmem_limit_bytes():
    # Generation-aware: ~3/4 of physical VMEM (v5e/v6e: 128 MiB -> 96 MiB; v7x: 64 -> 48 MiB).
    try:
        cap = int(pltpu.get_tpu_info().vmem_capacity_bytes)
    except Exception:
        cap = 64 * 1024 * 1024
    return max(32 * 1024 * 1024, (cap * 3) // 4)


# ---------------------------------------------------------------------------
# Fused kernel factory (layer count / mode / static dims baked in)
# ---------------------------------------------------------------------------

def _make_kernel(n_layers, mode, num_classes, tile_r, n_pad, d_pad, h_pad, c_pad):
    last = n_layers - 1

    def kernel(a_ref, x_ref, w_ref, b_ref, fcw_ref, fcb_ref, out_ref,
               h_prev_ref, h_next_ref, acc_ref):
        l = pl.program_id(0)                       # layer (outer, sequential)
        r = pl.program_id(1)                       # row block (inner)
        row0 = pl.multiple_of(r * tile_r, tile_r)

        # At the start of each layer, refresh the full previous-layer activations.
        @pl.when(r == 0)
        def _refresh():
            @pl.when(l == 0)
            def _from_x():
                h_prev_ref[...] = x_ref[...]

            @pl.when(l > 0)
            def _carry():
                h_prev_ref[...] = h_next_ref[...]

        a_blk = a_ref[...]                         # bf16 [tile_r, n_pad] (streamed)
        w = w_ref[0]                               # bf16 [d_pad, h_pad]
        b = b_ref[0]                               # f32  [1, h_pad]

        # GCN layer on this row block: relu((A_blk @ h_prev) @ W + b)
        agg = jnp.dot(a_blk, h_prev_ref[...],
                      preferred_element_type=jnp.float32)       # [tile_r, d_pad]
        z = jnp.dot(agg.astype(jnp.bfloat16), w,
                    preferred_element_type=jnp.float32) + b     # [tile_r, h_pad]
        h_new = jnp.maximum(z, 0.0)                # relu; dropout = identity (eval)

        # Stash activations for the next layer (ping-pong buffer).
        @pl.when(l < last)
        def _store_h():
            h_bf = h_new.astype(jnp.bfloat16)
            if d_pad > h_pad:
                h_bf = jnp.concatenate(
                    [h_bf, jnp.zeros((tile_r, d_pad - h_pad), jnp.bfloat16)], axis=1)
            h_next_ref[pl.ds(row0, tile_r), :] = h_bf

        # JumpingKnowledge accumulation.
        if mode == "max":
            prev = acc_ref[pl.ds(row0, tile_r), :]
            jk = jnp.where(l == 0, h_new, jnp.maximum(prev, h_new))
            acc_ref[pl.ds(row0, tile_r), :] = jk
        else:  # 'cat': incremental logits, no [N, L*H] slab
            fcw_l = fcw_ref[0]                     # bf16 [h_pad, c_pad]
            part = jnp.dot(h_new.astype(jnp.bfloat16), fcw_l,
                           preferred_element_type=jnp.float32)
            prev = acc_ref[pl.ds(row0, tile_r), :]
            acc = jnp.where(l == 0, part, prev + part)
            acc_ref[pl.ds(row0, tile_r), :] = acc

        # Final layer: fc + masked, numerically-stable log_softmax, lane-dense store.
        @pl.when(l == last)
        def _head():
            if mode == "max":
                logits = jnp.dot(jk.astype(jnp.bfloat16), fcw_ref[...],
                                 preferred_element_type=jnp.float32) + fcb_ref[...]
            else:
                logits = acc + fcb_ref[...]
            lane = lax.broadcasted_iota(jnp.int32, logits.shape, 1)
            logits = jnp.where(lane < num_classes, logits, jnp.float32(-1e30))
            m = jnp.max(logits, axis=1, keepdims=True)
            zc = logits - m
            lse = jnp.log(jnp.sum(jnp.exp(zc), axis=1, keepdims=True))
            out_ref[...] = zc - lse

    return kernel


# ---------------------------------------------------------------------------
# JKNet forward: pad, one pallas_call with (layer, row-block) grid, slice out
# ---------------------------------------------------------------------------

@functools.partial(jax.jit, static_argnames=("mode",))
def jknet_forward(x, a_hat, conv_weights, conv_biases, fc_w, fc_b, mode="max"):
    n, f = x.shape
    hidden = conv_weights[0].shape[1]
    classes = fc_w.shape[1]
    n_layers = len(conv_weights)

    n_pad = _round_up(n, 128)          # MXU-align N (M dim and A@h contraction dim)
    f_pad = _round_up(f, _LANE)
    h_pad = _round_up(hidden, _LANE)
    c_pad = _round_up(classes, _LANE)
    d_pad = max(f_pad, h_pad)          # common width for the h ping-pong buffers
    tile_r = _pick_row_tile(n_pad)
    n_blocks = n_pad // tile_r

    a_p = _pad_to(a_hat, (n_pad, n_pad)).astype(jnp.bfloat16)
    x_p = _pad_to(x, (n_pad, d_pad)).astype(jnp.bfloat16)

    w_stack = jnp.stack([_pad_to(w, (d_pad, h_pad)) for w in conv_weights]
                        ).astype(jnp.bfloat16)                          # [L, d_pad, h_pad]
    b_stack = jnp.stack([_pad_to(b.reshape(1, -1), (1, h_pad)) for b in conv_biases]
                        ).astype(jnp.float32)                           # [L, 1, h_pad]

    if mode == "max":
        fcw_p = _pad_to(fc_w, (h_pad, c_pad)).astype(jnp.bfloat16)      # [h_pad, c_pad]
        fcw_spec = pl.BlockSpec((h_pad, c_pad), lambda l, r: (0, 0))
        acc_scratch = pltpu.VMEM((n_pad, h_pad), jnp.float32)
    elif mode == "cat":
        fcw_p = jnp.pad(fc_w.reshape(n_layers, hidden, classes),
                        ((0, 0), (0, h_pad - hidden), (0, c_pad - classes))
                        ).astype(jnp.bfloat16)                          # [L, h_pad, c_pad]
        fcw_spec = pl.BlockSpec((1, h_pad, c_pad), lambda l, r: (l, 0, 0))
        acc_scratch = pltpu.VMEM((n_pad, c_pad), jnp.float32)
    else:
        raise ValueError("mode must be 'max' or 'cat'")
    fcb_p = _pad_to(fc_b.reshape(1, -1), (1, c_pad)).astype(jnp.float32)

    # Cost estimate so XLA schedules sensibly around the fused call.
    flops = 2 * n_layers * n_pad * n_pad * d_pad + 2 * n_layers * n_pad * d_pad * h_pad
    flops += (2 * n_layers if mode == "cat" else 2) * n_pad * h_pad * c_pad
    bytes_acc = (n_layers * n_pad * n_pad * 2      # A streamed once per layer
                 + n_pad * d_pad * 2               # x
                 + int(w_stack.size) * 2 + int(fcw_p.size) * 2
                 + n_pad * c_pad * 4)              # output
    cost = pl.CostEstimate(flops=int(flops), transcendentals=int(n_pad * c_pad),
                           bytes_accessed=int(bytes_acc))

    kernel = _make_kernel(n_layers, mode, classes, tile_r, n_pad, d_pad, h_pad, c_pad)

    out = pl.pallas_call(
        kernel,
        out_shape=jax.ShapeDtypeStruct((n_pad, c_pad), jnp.float32),
        grid_spec=pltpu.PrefetchScalarGridSpec(
            num_scalar_prefetch=0,
            grid=(n_layers, n_blocks),
            in_specs=[
                pl.BlockSpec((tile_r, n_pad), lambda l, r: (r, 0)),       # A row block (streamed)
                pl.BlockSpec((n_pad, d_pad), lambda l, r: (0, 0)),        # x (resident)
                pl.BlockSpec((1, d_pad, h_pad), lambda l, r: (l, 0, 0)),  # W_l
                pl.BlockSpec((1, 1, h_pad), lambda l, r: (l, 0, 0)),      # b_l
                fcw_spec,                                                 # fc weight
                pl.BlockSpec((1, c_pad), lambda l, r: (0, 0)),            # fc bias
            ],
            out_specs=pl.BlockSpec((tile_r, c_pad), lambda l, r: (r, 0)),
            scratch_shapes=[
                pltpu.VMEM((n_pad, d_pad), jnp.bfloat16),   # h_prev (full previous layer)
                pltpu.VMEM((n_pad, d_pad), jnp.bfloat16),   # h_next (being built)
                acc_scratch,                                # JK max / logits accumulator
            ],
        ),
        compiler_params=pltpu.CompilerParams(
            dimension_semantics=("arbitrary", "arbitrary"),
            vmem_limit_bytes=_vmem_limit_bytes(),
        ),
        cost_estimate=cost,
    )(a_p, x_p, w_stack, b_stack, fcw_p, fcb_p)

    return out[:n, :classes]


# ---------------------------------------------------------------------------
# Graph glue: dense GCN-normalized adjacency from edge_index (plain JAX)
# ---------------------------------------------------------------------------

def gcn_norm_dense(edge_index, num_nodes):
    src, dst = edge_index[0], edge_index[1]
    loops = jnp.arange(num_nodes, dtype=src.dtype)
    src = jnp.concatenate([src, loops])
    dst = jnp.concatenate([dst, loops])
    deg = jnp.zeros((num_nodes,), jnp.float32).at[dst].add(1.0)
    dinv = jnp.where(deg > 0, 1.0 / jnp.sqrt(deg), 0.0)
    norm = dinv[src] * dinv[dst]
    a_hat = jnp.zeros((num_nodes, num_nodes), jnp.float32).at[dst, src].add(norm)
    return a_hat


# ---------------------------------------------------------------------------
# Deterministic parameters + pure-JAX reference (f32) for validation
# ---------------------------------------------------------------------------

def make_params(key, features, classes, mode, n_layers, hidden):
    keys = jax.random.split(key, 2 * n_layers + 2)
    conv_weights, conv_biases = [], []
    in_dim = features
    for i in range(n_layers):
        scale = (2.0 / (in_dim + hidden)) ** 0.5
        w = scale * jax.random.normal(keys[2 * i], (in_dim, hidden), jnp.float32)
        b = jnp.zeros((1, hidden), jnp.float32)
        conv_weights.append(w)
        conv_biases.append(b)
        in_dim = hidden
    fc_in = hidden if mode == "max" else n_layers * hidden
    scale = (2.0 / (fc_in + classes)) ** 0.5
    fc_w = scale * jax.random.normal(keys[-2], (fc_in, classes), jnp.float32)
    fc_b = 0.01 * jax.random.normal(keys[-1], (1, classes), jnp.float32)
    return conv_weights, conv_biases, fc_w, fc_b


def jknet_reference(x, a_hat, conv_weights, conv_biases, fc_w, fc_b, mode):
    h = x
    layer_out = []
    for w, b in zip(conv_weights, conv_biases):
        h = jax.nn.relu(a_hat @ (h @ w) + b.reshape(1, -1))
        layer_out.append(h)
    if mode == "max":
        hjk = jnp.max(jnp.stack(layer_out), axis=0)
    else:
        hjk = jnp.concatenate(layer_out, axis=1)
    logits = hjk @ fc_w + fc_b.reshape(1, -1)
    return jax.nn.log_softmax(logits, axis=1)


if __name__ == "__main__":
    N, FEATURES, HIDDEN, CLASSES = 128, 32, 64, 16
    N_LAYERS, N_EDGES = 3, 512

    key = jax.random.PRNGKey(0)
    k_x, k_e, k_p = jax.random.split(key, 3)

    x = jax.random.normal(k_x, (N, FEATURES), jnp.float32)
    edge_index = jax.random.randint(k_e, (2, N_EDGES), 0, N, dtype=jnp.int32)
    a_hat = gcn_norm_dense(edge_index, N)

    for mode in ("max", "cat"):
        conv_w, conv_b, fc_w, fc_b = make_params(k_p, FEATURES, CLASSES, mode,
                                                 N_LAYERS, HIDDEN)
        out = jax.block_until_ready(
            jknet_forward(x, a_hat, conv_w, conv_b, fc_w, fc_b, mode=mode))
        assert out.shape == (N, CLASSES)
        # log_softmax rows should sum (in prob space) to ~1
        assert jnp.allclose(jnp.exp(out).sum(axis=1), 1.0, atol=1e-3)
        # f32 reference check (bf16 MXU tolerance)
        ref = jknet_reference(x, a_hat, conv_w, conv_b, fc_w, fc_b, mode)
        err = float(jnp.max(jnp.abs(out - ref)))
        assert err < 0.15, (mode, err)

    print("KERNEL_OK")
</pallas_src>

<mosaic_0001>
module attributes {stable_mosaic.version = 11 : i64} {
  func.func @kernel(%arg0: i32, %arg1: i32, %arg2: memref<128x128xbf16, #tpu.memory_space<vmem>>, %arg3: memref<128x128xbf16, #tpu.memory_space<vmem>>, %arg4: memref<1x128x128xbf16, #tpu.memory_space<vmem>>, %arg5: memref<1x1x128xf32, #tpu.memory_space<vmem>>, %arg6: memref<128x128xbf16, #tpu.memory_space<vmem>>, %arg7: memref<1x128xf32, #tpu.memory_space<vmem>>, %arg8: memref<128x128xf32, #tpu.memory_space<vmem>>, %arg9: memref<128x128xbf16, #tpu.memory_space<vmem>>, %arg10: memref<128x128xbf16, #tpu.memory_space<vmem>>, %arg11: memref<128x128xf32, #tpu.memory_space<vmem>>) attributes {dimension_semantics = [#tpu.dimension_semantics<arbitrary>, #tpu.dimension_semantics<arbitrary>], iteration_bounds = array<i64: 3, 1>, scalar_prefetch = 0 : i64, scratch_operands = 3 : i64, tpu.core_type = #tpu.core_type<tc>, window_params = [{transform_indices = @transform_0, window_bounds = array<i64: 128, 128>}, {pipeline_mode = #tpu.pipeline_mode<synchronous>, transform_indices = @transform_1, window_bounds = array<i64: 128, 128>}, {transform_indices = @transform_2, window_bounds = array<i64: 1, 128, 128>}, {transform_indices = @transform_3, window_bounds = array<i64: 1, 1, 128>}, {pipeline_mode = #tpu.pipeline_mode<synchronous>, transform_indices = @transform_4, window_bounds = array<i64: 128, 128>}, {pipeline_mode = #tpu.pipeline_mode<synchronous>, transform_indices = @transform_5, window_bounds = array<i64: 1, 128>}, {transform_indices = @transform_6, window_bounds = array<i64: 128, 128>}]} {
    %c128_i32 = arith.constant 128 : i32
    %0 = arith.muli %arg1, %c128_i32 : i32
    %1 = tpu.assume_multiple %0, 128 : i32
    %c0_i32 = arith.constant 0 : i32
    %2 = arith.cmpi eq, %arg1, %c0_i32 : i32
    %3 = arith.extui %2 : i1 to i32
    %c0_i32_0 = arith.constant 0 : i32
    %4 = arith.cmpi ne, %3, %c0_i32_0 : i32
    scf.if %4 {
      %c0_i32_18 = arith.constant 0 : i32
      %31 = arith.cmpi eq, %arg0, %c0_i32_18 : i32
      %32 = arith.extui %31 : i1 to i32
      %c0_i32_19 = arith.constant 0 : i32
      %33 = arith.cmpi ne, %32, %c0_i32_19 : i32
      scf.if %33 {
        %c0_22 = arith.constant 0 : index
        %c0_23 = arith.constant 0 : index
        %37 = vector.load %arg3[%c0_22, %c0_23] : memref<128x128xbf16, #tpu.memory_space<vmem>>, vector<128x128xbf16>
        %c0_24 = arith.constant 0 : index
        %c0_25 = arith.constant 0 : index
        %38 = vector.load %arg9[%c0_24, %c0_25] : memref<128x128xbf16, #tpu.memory_space<vmem>>, vector<128x128xbf16>
        tpu.vector_store %arg9[%c0_24, %c0_25], %37 {strides = array<i32>} : memref<128x128xbf16, #tpu.memory_space<vmem>>, vector<128x128xbf16>,
      } else {
      }
      %c0_i32_20 = arith.constant 0 : i32
      %34 = arith.cmpi sgt, %arg0, %c0_i32_20 : i32
      %35 = arith.extui %34 : i1 to i32
      %c0_i32_21 = arith.constant 0 : i32
      %36 = arith.cmpi ne, %35, %c0_i32_21 : i32
      scf.if %36 {
        %c0_22 = arith.constant 0 : index
        %c0_23 = arith.constant 0 : index
        %37 = vector.load %arg10[%c0_22, %c0_23] : memref<128x128xbf16, #tpu.memory_space<vmem>>, vector<128x128xbf16>
        %c0_24 = arith.constant 0 : index
        %c0_25 = arith.constant 0 : index
        %38 = vector.load %arg9[%c0_24, %c0_25] : memref<128x128xbf16, #tpu.memory_space<vmem>>, vector<128x128xbf16>
        tpu.vector_store %arg9[%c0_24, %c0_25], %37 {strides = array<i32>} : memref<128x128xbf16, #tpu.memory_space<vmem>>, vector<128x128xbf16>,
      } else {
      }
    } else {
    }
    %c0 = arith.constant 0 : index
    %c0_1 = arith.constant 0 : index
    %5 = vector.load %arg2[%c0, %c0_1] : memref<128x128xbf16, #tpu.memory_space<vmem>>, vector<128x128xbf16>
    %c0_2 = arith.constant 0 : index
    %c0_3 = arith.constant 0 : index
    %c0_4 = arith.constant 0 : index
    %6 = vector.load %arg4[%c0_2, %c0_3, %c0_4] : memref<1x128x128xbf16, #tpu.memory_space<vmem>>, vector<1x128x128xbf16>
    %7 = vector.shape_cast %6 : vector<1x128x128xbf16> to vector<128x128xbf16>
    %c0_5 = arith.constant 0 : index
    %c0_6 = arith.constant 0 : index
    %c0_7 = arith.constant 0 : index
    %8 = vector.load %arg5[%c0_5, %c0_6, %c0_7] : memref<1x1x128xf32, #tpu.memory_space<vmem>>, vector<1x1x128xf32>
    %9 = vector.shape_cast %8 : vector<1x1x128xf32> to vector<1x128xf32>
    %c0_8 = arith.constant 0 : index
    %c0_9 = arith.constant 0 : index
    %10 = vector.load %arg9[%c0_8, %c0_9] : memref<128x128xbf16, #tpu.memory_space<vmem>>, vector<128x128xbf16>
    %cst = arith.constant dense<0.000000e+00> : vector<128x128xf32>
    %11 = tpu.matmul %5, %10, %cst {dimension_numbers = #tpu.dot_dimension_numbers<[1], [0], [0], [1], [0, 0, 1, 1], [], []>} : vector<128x128xbf16>, vector<128x128xbf16>, vector<128x128xf32> -> vector<128x128xf32>
    %12 = arith.truncf %11 : vector<128x128xf32> to vector<128x128xbf16>
    %cst_10 = arith.constant dense<0.000000e+00> : vector<128x128xf32>
    %13 = tpu.matmul %12, %7, %cst_10 {dimension_numbers = #tpu.dot_dimension_numbers<[1], [0], [0], [1], [0, 0, 1, 1], [], []>} : vector<128x128xbf16>, vector<128x128xbf16>, vector<128x128xf32> -> vector<128x128xf32>
    %14 = vector.broadcast %9 : vector<1x128xf32> to vector<128x128xf32>
    %15 = arith.addf %13, %14 : vector<128x128xf32>
    %cst_11 = arith.constant 0.000000e+00 : f32
    %16 = vector.broadcast %cst_11 : f32 to vector<128x128xf32>
    %17 = arith.maximumf %15, %16 : vector<128x128xf32>
    %c2_i32 = arith.constant 2 : i32
    %18 = arith.cmpi slt, %arg0, %c2_i32 : i32
    %19 = arith.extui %18 : i1 to i32
    %c0_i32_12 = arith.constant 0 : i32
    %20 = arith.cmpi ne, %19, %c0_i32_12 : i32
    scf.if %20 {
      %31 = arith.truncf %17 : vector<128x128xf32> to vector<128x128xbf16>
      %32 = arith.index_cast %1 : i32 to index
      %c0_18 = arith.constant 0 : index
      %33 = vector.load %arg10[%32, %c0_18] : memref<128x128xbf16, #tpu.memory_space<vmem>>, vector<128x128xbf16>
      tpu.vector_store %arg10[%32, %c0_18], %31 {strides = array<i32>} : memref<128x128xbf16, #tpu.memory_space<vmem>>, vector<128x128xbf16>,
    } else {
    }
    %21 = arith.index_cast %1 : i32 to index
    %c0_13 = arith.constant 0 : index
    %22 = vector.load %arg11[%21, %c0_13] : memref<128x128xf32, #tpu.memory_space<vmem>>, vector<128x128xf32>
    %c0_i32_14 = arith.constant 0 : i32
    %23 = arith.cmpi eq, %arg0, %c0_i32_14 : i32
    %24 = arith.maximumf %22, %17 : vector<128x128xf32>
    %25 = arith.select %23, %17, %24 : vector<128x128xf32>
    %26 = arith.index_cast %1 : i32 to index
    %c0_15 = arith.constant 0 : index
    %27 = vector.load %arg11[%26, %c0_15] : memref<128x128xf32, #tpu.memory_space<vmem>>, vector<128x128xf32>
    tpu.vector_store %arg11[%26, %c0_15], %25 {strides = array<i32>} : memref<128x128xf32, #tpu.memory_space<vmem>>, vector<128x128xf32>,
    %c2_i32_16 = arith.constant 2 : i32
    %28 = arith.cmpi eq, %arg0, %c2_i32_16 : i32
    %29 = arith.extui %28 : i1 to i32
    %c0_i32_17 = arith.constant 0 : i32
    %30 = arith.cmpi ne, %29, %c0_i32_17 : i32
    scf.if %30 {
      %31 = arith.truncf %25 : vector<128x128xf32> to vector<128x128xbf16>
      %c0_18 = arith.constant 0 : index
      %c0_19 = arith.constant 0 : index
      %32 = vector.load %arg6[%c0_18, %c0_19] : memref<128x128xbf16, #tpu.memory_space<vmem>>, vector<128x128xbf16>
      %cst_20 = arith.constant dense<0.000000e+00> : vector<128x128xf32>
      %33 = tpu.matmul %31, %32, %cst_20 {dimension_numbers = #tpu.dot_dimension_numbers<[1], [0], [0], [1], [0, 0, 1, 1], [], []>} : vector<128x128xbf16>, vector<128x128xbf16>, vector<128x128xf32> -> vector<128x128xf32>
      %c0_21 = arith.constant 0 : index
      %c0_22 = arith.constant 0 : index
      %34 = vector.load %arg7[%c0_21, %c0_22] : memref<1x128xf32, #tpu.memory_space<vmem>>, vector<1x128xf32>
      %35 = vector.broadcast %34 : vector<1x128xf32> to vector<128x128xf32>
      %36 = arith.addf %33, %35 : vector<128x128xf32>
      %37 = tpu.iota {dimensions = array<i32: 1>} : vector<128x128xi32>
      %c16_i32 = arith.constant 16 : i32
      %38 = vector.broadcast %c16_i32 : i32 to vector<128x128xi32>
      %39 = arith.cmpi slt, %37, %38 : vector<128x128xi32>
      %cst_23 = arith.constant -1.000000e+30 : f32
      %40 = vector.broadcast %cst_23 : f32 to vector<128x128xf32>
      %41 = arith.select %39, %36, %40 : vector<128x128xi1>, vector<128x128xf32>
      %cst_24 = arith.constant dense<0xFF800000> : vector<128xf32>
      %42 = vector.multi_reduction <maximumf>, %41, %cst_24 [1] : vector<128x128xf32> to vector<128xf32>
      %43 = vector.shape_cast %42 : vector<128xf32> to vector<128x1xf32>
      %44 = vector.broadcast %43 : vector<128x1xf32> to vector<128x128xf32>
      %45 = arith.subf %41, %44 : vector<128x128xf32>
      %46 = math.exp %45 : vector<128x128xf32>
      %cst_25 = arith.constant dense<0.000000e+00> : vector<128xf32>
      %47 = vector.multi_reduction <add>, %46, %cst_25 [1] : vector<128x128xf32> to vector<128xf32>
      %48 = vector.shape_cast %47 : vector<128xf32> to vector<128x1xf32>
      %49 = math.log %48 : vector<128x1xf32>
      %50 = vector.broadcast %49 : vector<128x1xf32> to vector<128x128xf32>
      %51 = arith.subf %45, %50 : vector<128x128xf32>
      %c0_26 = arith.constant 0 : index
      %c0_27 = arith.constant 0 : index
      %52 = vector.load %arg8[%c0_26, %c0_27] : memref<128x128xf32, #tpu.memory_space<vmem>>, vector<128x128xf32>
      tpu.vector_store %arg8[%c0_26, %c0_27], %51 {strides = array<i32>} : memref<128x128xf32, #tpu.memory_space<vmem>>, vector<128x128xf32>,
    } else {
    }
    return
  }
  func.func @transform_0(%arg0: i32, %arg1: i32) -> (i32, i32) {
    %c0_i32 = arith.constant 0 : i32
    %c0_i32_0 = arith.constant 0 : i32
    return %arg1, %c0_i32 : i32, i32
  }
  func.func @transform_1(%arg0: i32, %arg1: i32) -> (i32, i32) {
    %c0_i32 = arith.constant 0 : i32
    %c0_i32_0 = arith.constant 0 : i32
    %c0_i32_1 = arith.constant 0 : i32
    return %c0_i32, %c0_i32_0 : i32, i32
  }
  func.func @transform_2(%arg0: i32, %arg1: i32) -> (i32, i32, i32) {
    %c0_i32 = arith.constant 0 : i32
    %c0_i32_0 = arith.constant 0 : i32
    %c0_i32_1 = arith.constant 0 : i32
    return %arg0, %c0_i32, %c0_i32_0 : i32, i32, i32
  }
  func.func @transform_3(%arg0: i32, %arg1: i32) -> (i32, i32, i32) {
    %c0_i32 = arith.constant 0 : i32
    %c0_i32_0 = arith.constant 0 : i32
    %c0_i32_1 = arith.constant 0 : i32
    return %arg0, %c0_i32, %c0_i32_0 : i32, i32, i32
  }
  func.func @transform_4(%arg0: i32, %arg1: i32) -> (i32, i32) {
    %c0_i32 = arith.constant 0 : i32
    %c0_i32_0 = arith.constant 0 : i32
    %c0_i32_1 = arith.constant 0 : i32
    return %c0_i32, %c0_i32_0 : i32, i32
  }
  func.func @transform_5(%arg0: i32, %arg1: i32) -> (i32, i32) {
    %c0_i32 = arith.constant 0 : i32
    %c0_i32_0 = arith.constant 0 : i32
    %c0_i32_1 = arith.constant 0 : i32
    return %c0_i32, %c0_i32_0 : i32, i32
  }
  func.func @transform_6(%arg0: i32, %arg1: i32) -> (i32, i32) {
    %c0_i32 = arith.constant 0 : i32
    %c0_i32_0 = arith.constant 0 : i32
    return %arg1, %c0_i32 : i32, i32
  }
}

</mosaic_0001>

<bundles_post_ra>
// kernel: jknet_forward.1
= control target key start
LH: loop header
LB: loop body
LE: loop exit
PB: predicated region body
PF: predicated region fallthrough
CT: control target
= control target key end

     0   :  { %s1711_s21 = smov 0   ;;  %s1713_s22 = smov 0   ;;  %s2162_s0 = inlined_call_operand.vmem [shape: bf16[128,128], index: 0, kind: input, shape index: {}]   ;;  %s2163_s1 = inlined_call_operand.vmem [shape: bf16[128,128], index: 1, kind: input, shape index: {}]   ;;  %s2164_s2 = inlined_call_operand.vmem [shape: bf16[3,128,128], index: 2, kind: input, shape index: {}]   ;;  %s2165_s3 = inlined_call_operand.vmem [shape: f32[3,1,128], index: 3, kind: input, shape index: {}]   ;;  %s2166_s4 = inlined_call_operand.vmem [shape: bf16[128,128], index: 4, kind: input, shape index: {}]   ;;  %s2167_s5 = inlined_call_operand.vmem [shape: f32[1,128], index: 5, kind: input, shape index: {}]   ;;  %s2168_s6 = inlined_call_operand.vmem [shape: f32[128,128], index: 6, kind: output, shape index: {}]  }
   0x1   :  { %s1715_s23 = smov 0  }
   0x2 LB: > { %s28_s24 = sadd.s32 1, %s1670_s22  ;;  %p1326_p0 = scmp.ge.s32.totalorder %s1674_s23, 1  ;;  %s1674_s23 = sphi %s1715_s23, %s16_s23   ;;  %s1670_s22 = sphi %s1713_s22, %s2172_s22   ;;  %s1666_s21 = sphi %s1711_s21, %s2171_s21  }
   0x3   : > { %p30_p1 = scmp.ge.s32.totalorder %s28_s24, 3  ;;  %p243_p2 = scmp.lt.s32.totalorder %s1674_s23, 4 }
   0x5   : > { %s2174_s24 = smov (%p30_p1, %s28_s24), 0  ;;  %p244_p3 = pnand %p1326_p0, %p243_p2 }
   0x6   : > { %p287_p4 = scmp.lt.s32.totalorder (!%p244_p3), %s1666_s21, 2  ;;  %p1329_p5 = scmp.ne.s32.totalorder (!%p244_p3), %s1666_s21, 0 }
   0x7   : > { %247 = sbr.rel (%p244_p3) target bundleno = 1131 (0x46b), region = 44 }
   0xe   : > { %s1733_s25 = scalar_select %p287_p4, %s1666_s21, 2 }
   0xf   : > { %310 = sbr.rel (%p1329_p5) target bundleno = 22 (0x16), region = 52  ;;  %v1556_v0 = vld [vmem:[%s2163_s1] sm:$0xff] (!%p1329_p5)   ;;  %v1557_v1 = vld [vmem:[%s2163_s1 + $0x8] sm:$0xff] (!%p1329_p5)   ;;  %v1558_v2 = vld [vmem:[%s2163_s1 + $0x10] sm:$0xff] (!%p1329_p5)  }
  0x10   : > { %s1371_s26 = sshll.u32 %s1733_s25, 6  ;;  %s294_s29 = scalar_lea.vmem %s2165_s3, %s1733_s25  ;;  %375 = vst [vmem:[#allocation2] sm:$0xff] (!%p1329_p5), %v1556_v0  ;;  %376 = vst [vmem:[#allocation2 + $0x8] sm:$0xff] (!%p1329_p5), %v1557_v1  ;;  %v1559_v3 = vld [vmem:[%s2163_s1 + $0x18] sm:$0xff] (!%p1329_p5)   ;;  %v1560_v4 = vld [vmem:[%s2163_s1 + $0x20] sm:$0xff] (!%p1329_p5)  }
  0x11   : > { %s1743_s8 = scalar_lea.vmem %s2164_s2, %s1371_s26  ;;  %377 = vst [vmem:[#allocation2 + $0x10] sm:$0xff] (!%p1329_p5), %v1558_v2  ;;  %378 = vst [vmem:[#allocation2 + $0x18] sm:$0xff] (!%p1329_p5), %v1559_v3  ;;  %v1561_v5 = vld [vmem:[%s2163_s1 + $0x28] sm:$0xff] (!%p1329_p5)   ;;  %v1562_v6 = vld [vmem:[%s2163_s1 + $0x30] sm:$0xff] (!%p1329_p5)  }
  0x12   : > { %379 = vst [vmem:[#allocation2 + $0x20] sm:$0xff] (!%p1329_p5), %v1560_v4  ;;  %380 = vst [vmem:[#allocation2 + $0x28] sm:$0xff] (!%p1329_p5), %v1561_v5  ;;  %v1563_v7 = vld [vmem:[%s2163_s1 + $0x38] sm:$0xff] (!%p1329_p5)  }
  0x13   : > { %381 = vst [vmem:[#allocation2 + $0x30] sm:$0xff] (!%p1329_p5), %v1562_v6  ;;  %382 = vst [vmem:[#allocation2 + $0x38] sm:$0xff] (!%p1329_p5), %v1563_v7 }
  0x16 PF: > { %p1338_p6 = scmp.le.s32.totalorder %s1666_s21, 0 }
  0x17   : > { %v387_v8 = vld [vmem:[#allocation3] sm:$0xff] (!%p1338_p6)  ;;  %v388_v9 = vld [vmem:[#allocation3 + $0x8] sm:$0xff] (!%p1338_p6)  ;;  %v389_v10 = vld [vmem:[#allocation3 + $0x10] sm:$0xff] (!%p1338_p6) }
  0x18   : > { %386 = sbr.rel (%p1338_p6) target bundleno = 31 (0x1f), region = 56  ;;  %395 = vst [vmem:[#allocation2] sm:$0xff] (!%p1338_p6), %v387_v8  ;;  %396 = vst [vmem:[#allocation2 + $0x8] sm:$0xff] (!%p1338_p6), %v388_v9  ;;  %v390_v11 = vld [vmem:[#allocation3 + $0x18] sm:$0xff] (!%p1338_p6)  ;;  %v391_v12 = vld [vmem:[#allocation3 + $0x20] sm:$0xff] (!%p1338_p6) }
  0x19   : > { %397 = vst [vmem:[#allocation2 + $0x10] sm:$0xff] (!%p1338_p6), %v389_v10  ;;  %v392_v13 = vld [vmem:[#allocation3 + $0x28] sm:$0xff] (!%p1338_p6)  ;;  %398 = vst [vmem:[#allocation2 + $0x18] sm:$0xff] (!%p1338_p6), %v390_v11  ;;  %v393_v14 = vld [vmem:[#allocation3 + $0x30] sm:$0xff] (!%p1338_p6) }
  0x1a   : > { %399 = vst [vmem:[#allocation2 + $0x20] sm:$0xff] (!%p1338_p6), %v391_v12  ;;  %400 = vst [vmem:[#allocation2 + $0x28] sm:$0xff] (!%p1338_p6), %v392_v13  ;;  %v394_v15 = vld [vmem:[#allocation3 + $0x38] sm:$0xff] (!%p1338_p6) }
  0x1b   : > { %401 = vst [vmem:[#allocation2 + $0x30] sm:$0xff] (!%p1338_p6), %v393_v14  ;;  %402 = vst [vmem:[#allocation2 + $0x38] sm:$0xff] (!%p1338_p6), %v394_v15 }
  0x1f PF: > { %v436_v16 = vld [vmem:[#allocation2] sm:$0xff]  ;;  %v437_v17 = vld [vmem:[#allocation2 + $0x8] sm:$0xff]  ;;  %v1574_v24 = vld [vmem:[%s1743_s8 + $0x10] sm:$0xff]   ;;  %p1356_p7 = scmp.ge.s32.totalorder %s1666_s21, 2 }
  0x20   : > { %1420 = vmatprep.subr.bf16.mxu0 %v436_v16  ;;  %v1564_v18 = vld [vmem:[%s2162_s0] sm:$0xff]   ;;  %v438_v19 = vld [vmem:[#allocation2 + $0x10] sm:$0xff]  ;;  %v439_v20 = vld [vmem:[#allocation2 + $0x18] sm:$0xff] }
  0x21   : > { %1421 = vmatpush3.bf16.msra.mxu0 %v436_v16  ;;  %1436 = vmatprep.mubr.bf16.mxu0 %v1564_v18  ;;  %v440_v21 = vld [vmem:[#allocation2 + $0x20] sm:$0xff]  ;;  %v1573_v23 = vld [vmem:[%s1743_s8 + $0x8] sm:$0xff]   ;;  %v1575_v26 = vld [vmem:[%s1743_s8 + $0x18] sm:$0xff]  }
  0x22   : > { %1422 = vmatprep.subr.bf16.mxu0 %v437_v17  ;;  %v1572_v22 = vld [vmem:[%s1743_s8] sm:$0xff]   ;;  %v441_v25 = vld [vmem:[#allocation2 + $0x28] sm:$0xff]  ;;  %v442_v27 = vld [vmem:[#allocation2 + $0x30] sm:$0xff] }
  0x23   : > { %1452 = vmatprep.subr.bf16.mxu1 %v1572_v22  ;;  %v1576_v28 = vld [vmem:[%s1743_s8 + $0x20] sm:$0xff]   ;;  %v443_v29 = vld [vmem:[#allocation2 + $0x38] sm:$0xff]  ;;  %v1577_v30 = vld [vmem:[%s1743_s8 + $0x28] sm:$0xff]  }
  0x24   : > { %1453 = vmatpush3.bf16.msra.mxu1 %v1572_v22  ;;  %v1565_v31 = vld [vmem:[%s2162_s0 + $0x8] sm:$0xff]   ;;  %v1566_v32 = vld [vmem:[%s2162_s0 + $0x10] sm:$0xff]   ;;  %v1567_v34 = vld [vmem:[%s2162_s0 + $0x18] sm:$0xff]  }
  0x25   : > { %1423 = vmatpush3.bf16.msra.mxu0 %v437_v17  ;;  %1454 = vmatprep.subr.bf16.mxu1 %v1573_v23  ;;  %v1578_v33 = vld [vmem:[%s1743_s8 + $0x30] sm:$0xff]   ;;  %v1568_v35 = vld [vmem:[%s2162_s0 + $0x20] sm:$0xff]   ;;  %v1569_v36 = vld [vmem:[%s2162_s0 + $0x28] sm:$0xff]  }
  0x26   : > { %1424 = vmatprep.subr.bf16.mxu0 %v438_v19  ;;  %v1570_v37 = vld [vmem:[%s2162_s0 + $0x30] sm:$0xff]   ;;  %v1571_v38 = vld [vmem:[%s2162_s0 + $0x38] sm:$0xff]   ;;  %v1347_v0 = vld [vmem:[%s294_s29] ss:$0 sm:$0xff] }
  0x27   : > { %v1579_v39 = vld [vmem:[%s1743_s8 + $0x38] sm:$0xff]  }
  0x28   : > { %1455 = vmatpush3.bf16.msra.mxu1 %v1573_v23 }
  0x29   : > { %1425 = vmatpush3.bf16.msra.mxu0 %v438_v19  ;;  %1456 = vmatprep.subr.bf16.mxu1 %v1574_v24 }
  0x2a   : > { %1426 = vmatprep.subr.bf16.mxu0 %v439_v20 }
  0x2c   : > { %1457 = vmatpush3.bf16.msra.mxu1 %v1574_v24 }
  0x2d   : > { %1427 = vmatpush3.bf16.msra.mxu0 %v439_v20  ;;  %1458 = vmatprep.subr.bf16.mxu1 %v1575_v26 }
  0x2e   : > { %1428 = vmatprep.subr.bf16.mxu0 %v440_v21 }
  0x30   : > { %1459 = vmatpush3.bf16.msra.mxu1 %v1575_v26 }
  0x31   : > { %1429 = vmatpush3.bf16.msra.mxu0 %v440_v21  ;;  %1460 = vmatprep.subr.bf16.mxu1 %v1576_v28 }
  0x32   : > { %1430 = vmatprep.subr.bf16.mxu0 %v441_v25 }
  0x34   : > { %1461 = vmatpush3.bf16.msra.mxu1 %v1576_v28 }
  0x35   : > { %1431 = vmatpush3.bf16.msra.mxu0 %v441_v25  ;;  %1462 = vmatprep.subr.bf16.mxu1 %v1577_v30 }
  0x36   : > { %1432 = vmatprep.subr.bf16.mxu0 %v442_v27 }
  0x38   : > { %1463 = vmatpush3.bf16.msra.mxu1 %v1577_v30 }
  0x39   : > { %1433 = vmatpush3.bf16.msra.mxu0 %v442_v27  ;;  %1464 = vmatprep.subr.bf16.mxu1 %v1578_v33 }
  0x3a   : > { %1434 = vmatprep.subr.bf16.mxu0 %v443_v29 }
  0x3c   : > { %1465 = vmatpush3.bf16.msra.mxu1 %v1578_v33 }
  0x3d   : > { %1435 = vmatpush3.bf16.msra.mxu0 %v443_v29  ;;  %1466 = vmatprep.subr.bf16.mxu1 %v1579_v39 }
  0x40   : > { %1437 = vmatmul.mubr.bf16.vlgmr.msra.gmra.mrb[0].mxu0 %v1565_v31  ;;  %1467 = vmatpush3.bf16.msra.mxu1 %v1579_v39 }
  0x41   : > { %1440 = vmatprep.mubr.bf16.mxu0 %v1566_v32 }
  0x48   : > { %1441 = vmatmul.mubr.bf16.gmra.mrb[4].mxu0 %v1567_v34 }
  0x49   : > { %1444 = vmatprep.mubr.bf16.mxu0 %v1568_v35 }
  0x50   : > { %1445 = vmatmul.mubr.bf16.gmra.mrb[8].mxu0 %v1569_v36 }
  0x51   : > { %1448 = vmatprep.mubr.bf16.mxu0 %v1570_v37 }
  0x58   : > { %1449 = vmatmul.mubr.bf16.gmra.mrb[12].mxu0 %v1571_v38 }
 0x113   : > { %v1438_v40 = vpop.f32.mrb[0].mxu0 }
 0x114   : > { %v526_v41 = vpop.f32.mrb[1].mxu0 }
 0x115   : > { %v1439_v42 = vpop.f32.mrb[2].mxu0 }
 0x116   : > { %v590_v43 = vpack.c.bf16 %v1439_v42, %v1438_v40  ;;  %v529_v44 = vpop.f32.mrb[3].mxu0 }
 0x117   : > { %v589_v45 = vpack.c.bf16 %v529_v44, %v526_v41 }
 0x119   : > { %1468 = vmatprep.mubr.bf16.mxu1 %v589_v45 }
 0x11a   : > { %1469 = vmatmul.mubr.bf16.vlgmr.msra.gmra.mrb[0].mxu1 %v590_v43 }
 0x11b   : > { %v1442_v46 = vpop.f32.mrb[4].mxu0 }
 0x11c   : > { %v542_v47 = vpop.f32.mrb[5].mxu0 }
 0x11d   : > { %v1443_v48 = vpop.f32.mrb[6].mxu0 }
 0x11e   : > { %v592_v49 = vpack.c.bf16 %v1443_v48, %v1442_v46  ;;  %v545_v50 = vpop.f32.mrb[7].mxu0 }
 0x11f   : > { %v591_v51 = vpack.c.bf16 %v545_v50, %v542_v47 }
 0x121   : > { %1472 = vmatprep.mubr.bf16.mxu1 %v591_v51 }
 0x122   : > { %1473 = vmatmul.mubr.bf16.gmra.mrb[4].mxu1 %v592_v49 }
 0x123   : > { %v1446_v52 = vpop.f32.mrb[8].mxu0 }
 0x124   : > { %v558_v53 = vpop.f32.mrb[9].mxu0 }
 0x125   : > { %v1447_v54 = vpop.f32.mrb[10].mxu0 }
 0x126   : > { %v594_v55 = vpack.c.bf16 %v1447_v54, %v1446_v52  ;;  %v561_v56 = vpop.f32.mrb[11].mxu0 }
 0x127   : > { %v593_v57 = vpack.c.bf16 %v561_v56, %v558_v53 }
 0x129   : > { %1476 = vmatprep.mubr.bf16.mxu1 %v593_v57 }
 0x12a   : > { %1477 = vmatmul.mubr.bf16.gmra.mrb[8].mxu1 %v594_v55 }
 0x12b   : > { %v1450_v58 = vpop.f32.mrb[12].mxu0 }
 0x12c   : > { %v574_v59 = vpop.f32.mrb[13].mxu0 }
 0x12d   : > { %v1451_v60 = vpop.f32.mrb[14].mxu0 }
 0x12e   : > { %v596_v61 = vpack.c.bf16 %v1451_v60, %v1450_v58  ;;  %v577_v62 = vpop.f32.mrb[15].mxu0 }
 0x12f   : > { %v595_v63 = vpack.c.bf16 %v577_v62, %v574_v59 }
 0x131   : > { %1480 = vmatprep.mubr.bf16.mxu1 %v595_v63 }
 0x132   : > { %1481 = vmatmul.mubr.bf16.gmra.mrb[12].mxu1 %v596_v61 }
 0x1ed   : > { %v1470_v1 = vpop.f32.mrb[0].mxu1 }
 0x1ee   : > { %v694_v2 = vadd.f32 %v1470_v1, %v1347_v0  ;;  %v685_v3 = vpop.f32.mrb[1].mxu1 }
 0x1ef   : > { %v686_v4 = vadd.f32 %v1347_v0, %v685_v3  ;;  %v1471_v5 = vpop.f32.mrb[2].mxu1 }
 0x1f0   : > { %v1808_v6 = vmax.f32 %v694_v2, 0.0  ;;  %v697_v7 = vadd.f32 %v1471_v5, %v1347_v0  ;;  %v688_v8 = vpop.f32.mrb[3].mxu1 }
 0x1f1   : > { %v1810_v9 = vmax.f32 %v686_v4, 0.0  ;;  %v689_v10 = vadd.f32 %v1347_v0, %v688_v8 }
 0x1f2   : > { %v1812_v11 = vmax.f32 %v697_v7, 0.0 }
 0x1f3   : > { %v1814_v12 = vmax.f32 %v689_v10, 0.0 }
 0x1f4   : > { %v769_v50 = vpack.c.bf16 (!%p1356_p7), %v1812_v11, %v1808_v6 }
 0x1f5   : > { %v1474_v13 = vpop.f32.mrb[4].mxu1  ;;  %v768_v49 = vpack.c.bf16 (!%p1356_p7), %v1814_v12, %v1810_v9 }
 0x1f6   : > { %v710_v14 = vadd.f32 %v1474_v13, %v1347_v0  ;;  %v701_v15 = vpop.f32.mrb[5].mxu1  ;;  %781 = vst [vmem:[#allocation3 + $0x8] sm:$0xff] (!%p1356_p7), %v769_v50 }
 0x1f7   : > { %v702_v16 = vadd.f32 %v1347_v0, %v701_v15  ;;  %v1475_v17 = vpop.f32.mrb[6].mxu1  ;;  %780 = vst [vmem:[#allocation3] sm:$0xff] (!%p1356_p7), %v768_v49 }
 0x1f8   : > { %v1816_v18 = vmax.f32 %v710_v14, 0.0  ;;  %v713_v19 = vadd.f32 %v1475_v17, %v1347_v0  ;;  %v704_v20 = vpop.f32.mrb[7].mxu1 }
 0x1f9   : > { %v1818_v21 = vmax.f32 %v702_v16, 0.0  ;;  %v705_v22 = vadd.f32 %v1347_v0, %v704_v20 }
 0x1fa   : > { %v1820_v23 = vmax.f32 %v713_v19, 0.0 }
 0x1fb   : > { %v1822_v24 = vmax.f32 %v705_v22, 0.0 }
 0x1fc   : > { %v771_v52 = vpack.c.bf16 (!%p1356_p7), %v1820_v23, %v1816_v18 }
 0x1fd   : > { %v1478_v25 = vpop.f32.mrb[8].mxu1  ;;  %v770_v51 = vpack.c.bf16 (!%p1356_p7), %v1822_v24, %v1818_v21 }
 0x1fe   : > { %v726_v26 = vadd.f32 %v1478_v25, %v1347_v0  ;;  %v717_v27 = vpop.f32.mrb[9].mxu1  ;;  %783 = vst [vmem:[#allocation3 + $0x18] sm:$0xff] (!%p1356_p7), %v771_v52 }
 0x1ff   : > { %v718_v28 = vadd.f32 %v1347_v0, %v717_v27  ;;  %v1479_v29 = vpop.f32.mrb[10].mxu1  ;;  %782 = vst [vmem:[#allocation3 + $0x10] sm:$0xff] (!%p1356_p7), %v770_v51 }
 0x200   : > { %v1824_v30 = vmax.f32 %v726_v26, 0.0  ;;  %v729_v31 = vadd.f32 %v1479_v29, %v1347_v0  ;;  %v720_v32 = vpop.f32.mrb[11].mxu1 }
 0x201   : > { %v1826_v33 = vmax.f32 %v718_v28, 0.0  ;;  %v721_v34 = vadd.f32 %v1347_v0, %v720_v32 }
 0x202   : > { %v1828_v35 = vmax.f32 %v729_v31, 0.0 }
 0x203   : > { %v1830_v36 = vmax.f32 %v721_v34, 0.0 }
 0x204   : > { %v773_v54 = vpack.c.bf16 (!%p1356_p7), %v1828_v35, %v1824_v30 }
 0x205   : > { %v1482_v37 = vpop.f32.mrb[12].mxu1  ;;  %767 = sbr.rel (%p1356_p7) target bundleno = 528 (0x210), region = 60  ;;  %v772_v53 = vpack.c.bf16 (!%p1356_p7), %v1830_v36, %v1826_v33 }
 0x206   : > { %v742_v38 = vadd.f32 %v1482_v37, %v1347_v0  ;;  %v733_v39 = vpop.f32.mrb[13].mxu1  ;;  %785 = vst [vmem:[#allocation3 + $0x28] sm:$0xff] (!%p1356_p7), %v773_v54 }
 0x207   : > { %v734_v40 = vadd.f32 %v1347_v0, %v733_v39  ;;  %v1483_v41 = vpop.f32.mrb[14].mxu1  ;;  %784 = vst [vmem:[#allocation3 + $0x20] sm:$0xff] (!%p1356_p7), %v772_v53 }
 0x208   : > { %v1832_v42 = vmax.f32 %v742_v38, 0.0  ;;  %v745_v43 = vadd.f32 %v1483_v41, %v1347_v0  ;;  %v736_v44 = vpop.f32.mrb[15].mxu1 }
 0x209   : > { %v1834_v45 = vmax.f32 %v734_v40, 0.0  ;;  %v737_v46 = vadd.f32 %v1347_v0, %v736_v44 }
 0x20a   : > { %v1836_v47 = vmax.f32 %v745_v43, 0.0 }
 0x20b   : > { %v1838_v48 = vmax.f32 %v737_v46, 0.0 }
 0x20c   : > { %v775_v56 = vpack.c.bf16 %v1836_v47, %v1832_v42 }
 0x20d   : > { %v774_v55 = vpack.c.bf16 %v1838_v48, %v1834_v45 }
 0x20e   : > { %787 = vst [vmem:[#allocation3 + $0x38] sm:$0xff] %v775_v56 }
 0x20f   : > { %786 = vst [vmem:[#allocation3 + $0x30] sm:$0xff] %v774_v55 }
 0x210 PF: > { %v789_v57 = vld [vmem:[#allocation4] sm:$0xff]  ;;  %p805_p8 = scmp.eq.s32.totalorder %s1666_s21, 0  ;;  %v790_v58 = vld [vmem:[#allocation4 + $0x8] sm:$0xff]  ;;  %v791_v59 = vld [vmem:[#allocation4 + $0x10] sm:$0xff]  ;;  %p1357_p9 = scmp.ne.s32.totalorder %s1666_s21, 2 }
 0x211   : > { %v806_v60 = vmax.f32 %v789_v57, %v1810_v9  ;;  %v792_v61 = vld [vmem:[#allocation4 + $0x18] sm:$0xff]  ;;  %v793_v62 = vld [vmem:[#allocation4 + $0x20] sm:$0xff]  ;;  %v794_v63 = vld [vmem:[#allocation4 + $0x28] sm:$0xff]  ;;  %v807_v0 = vmax.f32 %v790_v58, %v1814_v12  ;;  %v808_v1 = vmax.f32 %v791_v59, %v1808_v6  ;;  %v1037_v59 = vlaneseq (!%p1357_p9) }
 0x212   : > { %s822_s25 = scalar_select %p805_p8, 1, 0  ;;  %v809_v2 = vmax.f32 %v792_v61, %v1812_v11  ;;  %v810_v3 = vmax.f32 %v793_v62, %v1818_v21  ;;  %v795_v4 = vld [vmem:[#allocation4 + $0x30] sm:$0xff]  ;;  %v796_v5 = vld [vmem:[#allocation4 + $0x38] sm:$0xff]  ;;  %v797_v7 = vld [vmem:[#allocation4 + $0x40] sm:$0xff]  ;;  %v811_v8 = vmax.f32 %v794_v63, %v1822_v24 }
 0x213   : > { %v812_v10 = vmax.f32 %v795_v4, %v1816_v18  ;;  %v813_v13 = vmax.f32 %v796_v5, %v1820_v23  ;;  %v814_v14 = vmax.f32 %v797_v7, %v1826_v33  ;;  %v798_v15 = vld [vmem:[#allocation4 + $0x48] sm:$0xff]  ;;  %v799_v16 = vld [vmem:[#allocation4 + $0x50] sm:$0xff]  ;;  %v800_v17 = vld [vmem:[#allocation4 + $0x58] sm:$0xff] }
 0x214   : > { %v823_v19 = vstv %s822_s25  ;;  %v815_v20 = vmax.f32 %v798_v15, %v1830_v36  ;;  %v816_v22 = vmax.f32 %v799_v16, %v1824_v30  ;;  %v817_v25 = vmax.f32 %v800_v17, %v1828_v35  ;;  %v801_v26 = vld [vmem:[#allocation4 + $0x60] sm:$0xff]  ;;  %v802_v27 = vld [vmem:[#allocation4 + $0x68] sm:$0xff]  ;;  %v803_v28 = vld [vmem:[#allocation4 + $0x70] sm:$0xff] }
 0x215   : > { %vm1870_vm0 = vcmp.eq.s32.totalorder %v823_v19, 1  ;;  %v818_v31 = vmax.f32 %v801_v26, %v1834_v45  ;;  %v819_v32 = vmax.f32 %v802_v27, %v1838_v48  ;;  %v820_v34 = vmax.f32 %v803_v28, %v1832_v42  ;;  %v804_v41 = vld [vmem:[#allocation4 + $0x78] sm:$0xff]  ;;  %v1580_v44 = vld [vmem:[%s2166_s4] sm:$0xff] (!%p1357_p9)   ;;  %v1585_v50 = vld [vmem:[%s2166_s4 + $0x28] sm:$0xff] (!%p1357_p9)  }
 0x216   : > { %v825_v37 = vsel %vm1870_vm0, %v1810_v9, %v806_v60  ;;  %v826_v38 = vsel %vm1870_vm0, %v1814_v12, %v807_v0  ;;  %v1886_v39 = vsel %vm1870_vm0, %v1808_v6, %v808_v1  ;;  %v1891_v40 = vsel %vm1870_vm0, %v1812_v11, %v809_v2  ;;  %1484 = vmatprep.subr.bf16.mxu0 (!%p1357_p9), %v1580_v44  ;;  %v1584_v49 = vld [vmem:[%s2166_s4 + $0x20] sm:$0xff] (!%p1357_p9)   ;;  %v1586_v51 = vld [vmem:[%s2166_s4 + $0x30] sm:$0xff] (!%p1357_p9)   ;;  %v1587_v52 = vld [vmem:[%s2166_s4 + $0x38] sm:$0xff] (!%p1357_p9)  }
 0x217   : > { %841 = vst [vmem:[#allocation4] sm:$0xff] %v825_v37  ;;  %842 = vst [vmem:[#allocation4 + $0x8] sm:$0xff] %v826_v38  ;;  %v1898_v9 = vsel %vm1870_vm0, %v1818_v21, %v810_v3  ;;  %v1903_v6 = vsel %vm1870_vm0, %v1822_v24, %v811_v8  ;;  %v1908_v11 = vsel %vm1870_vm0, %v1816_v18, %v812_v10  ;;  %1516 = vmatprep.subr.bf16.mxu1 (!%p1357_p9), %v1580_v44  ;;  %v1358_v61 = vld [vmem:[%s2167_s5] ss:$0 sm:$0xff] (!%p1357_p9) }
 0x218   : > { %843 = vst [vmem:[#allocation4 + $0x10] sm:$0xff] %v1886_v39  ;;  %844 = vst [vmem:[#allocation4 + $0x18] sm:$0xff] %v1891_v40  ;;  %v1913_v12 = vsel %vm1870_vm0, %v1820_v23, %v813_v13  ;;  %v833_v21 = vsel %vm1870_vm0, %v1826_v33, %v814_v14  ;;  %v834_v18 = vsel %vm1870_vm0, %v1830_v36, %v815_v20  ;;  %860 = sbr.rel (%p1357_p9) target bundleno = 1131 (0x46b), region = 64  ;;  %1485 = vmatpush3.bf16.msra.mxu0 (!%p1357_p9), %v1580_v44 }
 0x219   : > { %845 = vst [vmem:[#allocation4 + $0x20] sm:$0xff] %v1898_v9  ;;  %846 = vst [vmem:[#allocation4 + $0x28] sm:$0xff] %v1903_v6  ;;  %v1928_v23 = vsel %vm1870_vm0, %v1824_v30, %v816_v22  ;;  %v1933_v24 = vsel %vm1870_vm0, %v1828_v35, %v817_v25  ;;  %v837_v33 = vsel %vm1870_vm0, %v1834_v45, %v818_v31  ;;  %1524 = vmatpush3.bf16.msra.mxu1 (!%p1357_p9), %v1580_v44 }
 0x21a   : > { %847 = vst [vmem:[#allocation4 + $0x30] sm:$0xff] %v1908_v11  ;;  %848 = vst [vmem:[#allocation4 + $0x38] sm:$0xff] %v1913_v12  ;;  %v838_v30 = vsel %vm1870_vm0, %v1838_v48, %v819_v32  ;;  %v1946_v36 = vsel %vm1870_vm0, %v1832_v42, %v820_v34  ;;  %v821_v35 = vmax.f32 %v804_v41, %v1836_v47  ;;  %v1581_v42 = vld [vmem:[%s2166_s4 + $0x8] sm:$0xff] (!%p1357_p9)   ;;  %v1583_v48 = vld [vmem:[%s2166_s4 + $0x18] sm:$0xff] (!%p1357_p9)   ;;  %v1987_v60 = vand.u32 (!%p1357_p9), 127, %v1037_v59 }
 0x21b   : > { %849 = vst [vmem:[#allocation4 + $0x40] sm:$0xff] %v833_v21  ;;  %850 = vst [vmem:[#allocation4 + $0x48] sm:$0xff] %v834_v18  ;;  %v861_v45 = vpack.c.bf16 (!%p1357_p9), %v826_v38, %v825_v37  ;;  %v865_v46 = vpack.c.bf16 (!%p1357_p9), %v834_v18, %v833_v21  ;;  %1486 = vmatprep.subr.bf16.mxu0 (!%p1357_p9), %v1581_v42  ;;  %1517 = vmatprep.subr.bf16.mxu1 (!%p1357_p9), %v1581_v42 }
 0x21c   : > { %851 = vst [vmem:[#allocation4 + $0x50] sm:$0xff] %v1928_v23  ;;  %852 = vst [vmem:[#allocation4 + $0x58] sm:$0xff] %v1933_v24  ;;  %v840_v43 = vsel %vm1870_vm0, %v1836_v47, %v821_v35  ;;  %v1582_v47 = vld [vmem:[%s2166_s4 + $0x10] sm:$0xff] (!%p1357_p9)   ;;  %1487 = vmatpush3.bf16.msra.mxu0 (!%p1357_p9), %v1581_v42  ;;  %v862_v53 = vpack.c.bf16 (!%p1357_p9), %v1891_v40, %v1886_v39  ;;  %v866_v54 = vpack.c.bf16 (!%p1357_p9), %v1933_v24, %v1928_v23 }
 0x21d   : > { %853 = vst [vmem:[#allocation4 + $0x60] sm:$0xff] %v837_v33  ;;  %854 = vst [vmem:[#allocation4 + $0x68] sm:$0xff] %v838_v30  ;;  %1500 = vmatprep.mubr.bf16.mxu0 (!%p1357_p9), %v861_v45  ;;  %1508 = vmatprep.mubr.bf16.mxu1 (!%p1357_p9), %v865_v46  ;;  %v863_v55 = vpack.c.bf16 (!%p1357_p9), %v1903_v6, %v1898_v9  ;;  %v867_v56 = vpack.c.bf16 (!%p1357_p9), %v838_v30, %v837_v33  ;;  %vm1039_vm1 = vcmp.lt.s32.totalorder (!%p1357_p9), %v1987_v60, 16 }
 0x21e   : > { %855 = vst [vmem:[#allocation4 + $0x70] sm:$0xff] %v1946_v36  ;;  %856 = vst [vmem:[#allocation4 + $0x78] sm:$0xff] %v840_v43  ;;  %1525 = vmatpush3.bf16.msra.mxu1 (!%p1357_p9), %v1581_v42  ;;  %1488 = vmatprep.subr.bf16.mxu0 (!%p1357_p9), %v1582_v47  ;;  %v864_v57 = vpack.c.bf16 (!%p1357_p9), %v1913_v12, %v1908_v11  ;;  %v868_v58 = vpack.c.bf16 (!%p1357_p9), %v840_v43, %v1946_v36 }
 0x21f   : > { %1518 = vmatprep.subr.bf16.mxu1 %v1582_v47 }
 0x220   : > { %1489 = vmatpush3.bf16.msra.mxu0 %v1582_v47 }
 0x221   : > { %1490 = vmatprep.subr.bf16.mxu0 %v1583_v48 }
 0x222   : > { %1526 = vmatpush3.bf16.msra.mxu1 %v1582_v47 }
 0x223   : > { %1519 = vmatprep.subr.bf16.mxu1 %v1583_v48 }
 0x224   : > { %1491 = vmatpush3.bf16.msra.mxu0 %v1583_v48 }
 0x225   : > { %1492 = vmatprep.subr.bf16.mxu0 %v1584_v49 }
 0x226   : > { %1527 = vmatpush3.bf16.msra.mxu1 %v1583_v48 }
 0x227   : > { %1520 = vmatprep.subr.bf16.mxu1 %v1584_v49 }
 0x228   : > { %1493 = vmatpush3.bf16.msra.mxu0 %v1584_v49 }
 0x229   : > { %1494 = vmatprep.subr.bf16.mxu0 %v1585_v50 }
 0x22a   : > { %1528 = vmatpush3.bf16.msra.mxu1 %v1584_v49 }
 0x22b   : > { %1521 = vmatprep.subr.bf16.mxu1 %v1585_v50 }
 0x22c   : > { %1495 = vmatpush3.bf16.msra.mxu0 %v1585_v50 }
 0x22d   : > { %1496 = vmatprep.subr.bf16.mxu0 %v1586_v51 }
 0x22e   : > { %1529 = vmatpush3.bf16.msra.mxu1 %v1585_v50 }
 0x22f   : > { %1522 = vmatprep.subr.bf16.mxu1 %v1586_v51 }
 0x230   : > { %1497 = vmatpush3.bf16.msra.mxu0 %v1586_v51 }
 0x231   : > { %1498 = vmatprep.subr.bf16.mxu0 %v1587_v52 }
 0x232   : > { %1530 = vmatpush3.bf16.msra.mxu1 %v1586_v51 }
 0x233   : > { %1523 = vmatprep.subr.bf16.mxu1 %v1587_v52 }
 0x234   : > { %1499 = vmatpush3.bf16.msra.mxu0 %v1587_v52 }
 0x236   : > { %1531 = vmatpush3.bf16.msra.mxu1 %v1587_v52 }
 0x237   : > { %1501 = vmatmul.mubr.bf16.vlgmr.msra.gmra.mrb[0].mxu0 %v862_v53 }
 0x238   : > { %1504 = vmatprep.mubr.bf16.mxu0 %v863_v55 }
 0x239   : > { %1509 = vmatmul.mubr.bf16.vlgmr.msra.gmra.mrb[0].mxu1 %v866_v54 }
 0x23a   : > { %1512 = vmatprep.mubr.bf16.mxu1 %v867_v56 }
 0x23f   : > { %1505 = vmatmul.mubr.bf16.gmra.mrb[4].mxu0 %v864_v57 }
 0x241   : > { %1513 = vmatmul.mubr.bf16.gmra.mrb[4].mxu1 %v868_v58 }
 0x30a   : > { %v1502_v62 = vpop.f32.mrb[0].mxu0 }
 0x30b   : > { %v983_v0 = vadd.f32 %v1502_v62, %v1358_v61  ;;  %v974_v2 = vpop.f32.mrb[1].mxu0 }
 0x30c   : > { %v1510_v63 = vpop.f32.mrb[0].mxu1  ;;  %v1503_v4 = vpop.f32.mrb[2].mxu0  ;;  %v975_v7 = vadd.f32 %v1358_v61, %v974_v2 }
 0x30d   : > { %v1015_v1 = vadd.f32 %v1510_v63, %v1358_v61  ;;  %v1006_v3 = vpop.f32.mrb[1].mxu1  ;;  %v986_v8 = vadd.f32 %v1503_v4, %v1358_v61  ;;  %v977_v10 = vpop.f32.mrb[3].mxu0  ;;  %v1042_v15 = vsel %vm1039_vm1, %v983_v0, -1e+30 }
 0x30e   : > { %v1511_v5 = vpop.f32.mrb[2].mxu1  ;;  %1060 = vmax.xlane.f32.xlu1 %v1042_v15  ;;  %v1007_v16 = vadd.f32 %v1358_v61, %v1006_v3  ;;  %v1040_v20 = vsel %vm1039_vm1, %v975_v7, -1e+30  ;;  %v978_v31 = vadd.f32 %v1358_v61, %v977_v10 }
 0x30f   : > { %v1009_v13 = vpop.f32.mrb[3].mxu1  ;;  %v1050_v14 = vsel %vm1039_vm1, %v1015_v1, -1e+30  ;;  %v1018_v17 = vadd.f32 %v1511_v5, %v1358_v61  ;;  %v1043_v19 = vsel %vm1039_vm1, %v986_v8, -1e+30 }
 0x310   : > { %1076 = vmax.xlane.f32.xlu0 %v1050_v14  ;;  %v1010_v32 = vadd.f32 %v1358_v61, %v1009_v13  ;;  %v1048_v37 = vsel %vm1039_vm1, %v1007_v16, -1e+30  ;;  %v1041_v6 = vsel %vm1039_vm1, %v978_v31, -1e+30 }
 0x311   : > { %v1051_v34 = vsel %vm1039_vm1, %v1018_v17, -1e+30 }
 0x312   : > { %1062 = vmax.xlane.f32.xlu1 %v1043_v19  ;;  %v1506_v22 = vpop.f32.mrb[4].mxu0  ;;  %v1049_v9 = vsel %vm1039_vm1, %v1010_v32, -1e+30 }
 0x313   : > { %v990_v26 = vpop.f32.mrb[5].mxu0  ;;  %v999_v40 = vadd.f32 %v1506_v22, %v1358_v61 }
 0x314   : > { %1056 = vmax.xlane.f32.xlu0 %v1040_v20  ;;  %v1514_v25 = vpop.f32.mrb[4].mxu1  ;;  %v1507_v28 = vpop.f32.mrb[6].mxu0  ;;  %v991_v21 = vadd.f32 %v1358_v61, %v990_v26 }
 0x315   : > { %v1022_v27 = vpop.f32.mrb[5].mxu1  ;;  %v993_v38 = vpop.f32.mrb[7].mxu0  ;;  %v1002_v41 = vadd.f32 %v1507_v28, %v1358_v61  ;;  %v1046_v12 = vsel %vm1039_vm1, %v999_v40, -1e+30  ;;  %v1031_v43 = vadd.f32 %v1514_v25, %v1358_v61 }
 0x316   : > { %v1515_v29 = vpop.f32.mrb[6].mxu1  ;;  %1078 = vmax.xlane.f32.xlu1 %v1051_v34  ;;  %v994_v18 = vadd.f32 %v1358_v61, %v993_v38  ;;  %v1023_v23 = vadd.f32 %v1358_v61, %v1022_v27  ;;  %v1044_v30 = vsel %vm1039_vm1, %v991_v21, -1e+30 }
 0x317   : > { %v1025_v39 = vpop.f32.mrb[7].mxu1  ;;  %v1047_v11 = vsel %vm1039_vm1, %v1002_v41, -1e+30  ;;  %v1034_v44 = vadd.f32 %v1515_v29, %v1358_v61  ;;  %v2033_v45 = vsel %vm1039_vm1, %v1031_v43, -1e+30 }
 0x318   : > { %1072 = vmax.xlane.f32.xlu0 %v1048_v37  ;;  %v1026_v24 = vadd.f32 %v1358_v61, %v1025_v39  ;;  %v1045_v33 = vsel %vm1039_vm1, %v994_v18, -1e+30  ;;  %v2023_v35 = vsel %vm1039_vm1, %v1023_v23, -1e+30 }
 0x319   : > { %v2029_v42 = vsel %vm1039_vm1, %v1034_v44, -1e+30 }
 0x31a   : > { %1074 = vmax.xlane.f32.xlu1 %v1049_v9  ;;  %v2019_v36 = vsel %vm1039_vm1, %v1026_v24, -1e+30 }
 0x31c   : > { %1058 = vmax.xlane.f32.xlu0 %v1041_v6 }
 0x31e   : > { %1070 = vmax.xlane.f32.xlu1 %v1047_v11 }
 0x320   : > { %1068 = vmax.xlane.f32.xlu0 %v1046_v12 }
 0x322   : > { %1066 = vmax.xlane.f32.xlu1 %v1045_v33 }
 0x324   : > { %1064 = vmax.xlane.f32.xlu0 %v1044_v30 }
 0x326   : > { %1082 = vmax.xlane.f32.xlu1 %v2019_v36 }
 0x328   : > { %1080 = vmax.xlane.f32.xlu0 %v2023_v35 }
 0x32a   : > { %1086 = vmax.xlane.f32.xlu1 %v2029_v42 }
 0x32c   : > { %1084 = vmax.xlane.f32.xlu0 %v2033_v45 }
 0x39b   : > { %v1061_v47 = vpop.xlane.xlu1 %1060 }
 0x39c   : > { %v2037_v48 = vsub.f32 %v1042_v15, %v1061_v47 }
 0x39d   : > { %v1077_v46 = vpop.xlane.xlu0 %1076 }
 0x39e   : > { %v2039_v49 = vsub.f32 %v1050_v14, %v1077_v46  ;;  %v1108_v50 = vmul.f32 1.442695, %v2037_v48 }
 0x39f   : > { %v1063_v51 = vpop.xlane.xlu1 %1062 }
 0x3a0   : > { %v2042_v53 = vsub.f32 %v1043_v19, %v1063_v51  ;;  %v1124_v54 = vmul.f32 1.442695, %v2039_v49  ;;  %1588 = vpow2.f32 %v1108_v50 }
 0x3a1   : > { %v1057_v52 = vpop.xlane.xlu0 %1056 }
 0x3a2   : > { %v2045_v55 = vsub.f32 %v1040_v20, %v1057_v52  ;;  %v1110_v56 = vmul.f32 1.442695, %v2042_v53 }
 0x3a3   : > { %v1079_v57 = vpop.xlane.xlu1 %1078 }
 0x3a4   : > { %1590 = vpow2.f32 %v1110_v56  ;;  %v2048_v59 = vsub.f32 %v1051_v34, %v1079_v57  ;;  %v1104_v61 = vmul.f32 1.442695, %v2045_v55 }
 0x3a5   : > { %v1073_v58 = vpop.xlane.xlu0 %1072  ;;  %1592 = vpow2.f32 %v1124_v54 }
 0x3a6   : > { %v2050_v60 = vsub.f32 %v1048_v37, %v1073_v58  ;;  %v1126_v62 = vmul.f32 1.442695, %v2048_v59 }
 0x3a7   : > { %v1075_v63 = vpop.xlane.xlu1 %1074 }
 0x3a8   : > { %1594 = vpow2.f32 %v1126_v62  ;;  %v1120_v1 = vmul.f32 1.442695, %v2050_v60  ;;  %v2055_v2 = vsub.f32 %v1049_v9, %v1075_v63 }
 0x3a9   : > { %v1059_v0 = vpop.xlane.xlu0 %1058  ;;  %1596 = vpow2.f32 %v1104_v61 }
 0x3aa   : > { %v2057_v3 = vsub.f32 %v1041_v6, %v1059_v0  ;;  %v1589_v5 = vpop.eup %1588  ;;  %1598 = vpow2.f32 %v1120_v1  ;;  %v1122_v10 = vmul.f32 1.442695, %v2055_v2 }
 0x3ab   : > { %v1071_v7 = vpop.xlane.xlu1 %1070  ;;  %1140 = vadd.xlane.f32.xlu0 %v1589_v5 }
 0x3ac   : > { %v1106_v4 = vmul.f32 1.442695, %v2057_v3  ;;  %v2061_v13 = vsub.f32 %v1047_v11, %v1071_v7 }
 0x3ad   : > { %v1069_v8 = vpop.xlane.xlu0 %1068 }
 0x3ae   : > { %v2063_v14 = vsub.f32 %v1046_v12, %v1069_v8  ;;  %1600 = vpow2.f32 %v1106_v4  ;;  %v1591_v15 = vpop.eup %1590  ;;  %v1118_v22 = vmul.f32 1.442695, %v2061_v13 }
 0x3af   : > { %v1593_v17 = vpop.eup %1592  ;;  %1142 = vadd.xlane.f32.xlu1 %v1591_v15  ;;  %v1067_v19 = vpop.xlane.xlu1 %1066  ;;  %1602 = vpow2.f32 %v1122_v10 }
 0x3b0   : > { %v1116_v16 = vmul.f32 1.442695, %v2063_v14  ;;  %v2067_v25 = vsub.f32 %v1045_v33, %v1067_v19  ;;  %1156 = vadd.xlane.f32.xlu0 %v1593_v17 }
 0x3b1   : > { %v1065_v20 = vpop.xlane.xlu0 %1064 }
 0x3b2   : > { %v2069_v26 = vsub.f32 %v1044_v30, %v1065_v20  ;;  %1604 = vpow2.f32 %v1116_v16  ;;  %v1595_v27 = vpop.eup %1594  ;;  %v1114_v34 = vmul.f32 1.442695, %v2067_v25 }
 0x3b3   : > { %v1597_v29 = vpop.eup %1596  ;;  %1158 = vadd.xlane.f32.xlu1 %v1595_v27  ;;  %v1083_v31 = vpop.xlane.xlu1 %1082  ;;  %1606 = vpow2.f32 %v1118_v22 }
 0x3b4   : > { %v1112_v28 = vmul.f32 1.442695, %v2069_v26  ;;  %v2074_v37 = vsub.f32 %v2019_v36, %v1083_v31  ;;  %1136 = vadd.xlane.f32.xlu0 %v1597_v29  ;;  %v1599_v39 = vpop.eup %1598 }
 0x3b5   : > { %v1081_v32 = vpop.xlane.xlu0 %1080 }
 0x3b6   : > { %v2077_v38 = vsub.f32 %v2023_v35, %v1081_v32  ;;  %1608 = vpow2.f32 %v1112_v28  ;;  %v1130_v11 = vmul.f32 1.442695, %v2074_v37 }
 0x3b7   : > { %v1087_v9 = vpop.xlane.xlu1 %1086  ;;  %1610 = vpow2.f32 %v1114_v34 }
 0x3b8   : > { %v1128_v40 = vmul.f32 1.442695, %v2077_v38  ;;  %v1601_v41 = vpop.eup %1600  ;;  %1152 = vadd.xlane.f32.xlu0 %v1599_v39  ;;  %v2085_v21 = vsub.f32 %v2029_v42, %v1087_v9 }
 0x3b9   : > { %v1085_v6 = vpop.xlane.xlu0 %1084  ;;  %1138 = vadd.xlane.f32.xlu1 %v1601_v41  ;;  %v1603_v18 = vpop.eup %1602 }
 0x3ba   : > { %v2082_v12 = vsub.f32 %v2033_v45, %v1085_v6  ;;  %1612 = vpow2.f32 %v1128_v40  ;;  %v1134_v33 = vmul.f32 1.442695, %v2085_v21 }
 0x3bb   : > { %1614 = vpow2.f32 %v1130_v11 }
 0x3bc   : > { %v1132_v23 = vmul.f32 1.442695, %v2082_v12  ;;  %v1605_v24 = vpop.eup %1604 }
 0x3bd   : > { %1154 = vadd.xlane.f32.xlu1 %v1603_v18  ;;  %1148 = vadd.xlane.f32.xlu0 %v1605_v24  ;;  %v1607_v30 = vpop.eup %1606 }
 0x3be   : > { %1616 = vpow2.f32 %v1132_v23 }
 0x3bf   : > { %1618 = vpow2.f32 %v1134_v33 }
 0x3c0   : > { %v1609_v36 = vpop.eup %1608 }
 0x3c1   : > { %1150 = vadd.xlane.f32.xlu1 %v1607_v30  ;;  %1144 = vadd.xlane.f32.xlu0 %v1609_v36  ;;  %v1611_v35 = vpop.eup %1610 }
 0x3c4   : > { %v1613_v43 = vpop.eup %1612 }
 0x3c5   : > { %1146 = vadd.xlane.f32.xlu1 %v1611_v35  ;;  %1160 = vadd.xlane.f32.xlu0 %v1613_v43  ;;  %v1615_v44 = vpop.eup %1614 }
 0x3c8   : > { %v1617_v42 = vpop.eup %1616 }
 0x3c9   : > { %1162 = vadd.xlane.f32.xlu1 %v1615_v44  ;;  %1164 = vadd.xlane.f32.xlu0 %v1617_v42  ;;  %v1619_v45 = vpop.eup %1618 }
 0x3cd   : > { %1166 = vadd.xlane.f32.xlu1 %v1619_v45 }
 0x438   : > { %v1141_v46 = vpop.xlane.xlu0 %1140 }
 0x439   : > { %1620 = vlog2.f32 %v1141_v46 }
 0x43c   : > { %v1143_v47 = vpop.xlane.xlu1 %1142 }
 0x43d   : > { %1622 = vlog2.f32 %v1143_v47  ;;  %v1157_v50 = vpop.xlane.xlu0 %1156 }
 0x43e   : > { %1624 = vlog2.f32 %v1157_v50 }
 0x440   : > { %v1159_v51 = vpop.xlane.xlu1 %1158 }
 0x441   : > { %1626 = vlog2.f32 %v1159_v51  ;;  %v1137_v52 = vpop.xlane.xlu0 %1136 }
 0x442   : > { %1628 = vlog2.f32 %v1137_v52 }
 0x443   : > { %v1621_v54 = vpop.eup %1620 }
 0x444   : > { %v1173_v56 = vmul.f32 0.6931472, %v1621_v54 }
 0x445   : > { %v1153_v58 = vpop.xlane.xlu0 %1152 }
 0x446   : > { %v1139_v57 = vpop.xlane.xlu1 %1138  ;;  %v1202_v62 = vsub.f32 %v2037_v48, %v1173_v56 }
 0x447   : > { %1630 = vlog2.f32 %v1139_v57  ;;  %v1623_v61 = vpop.eup %1622 }
 0x448   : > { %1632 = vlog2.f32 %v1153_v58  ;;  %v1625_v63 = vpop.eup %1624  ;;  %v1175_v0 = vmul.f32 0.6931472, %v1623_v61  ;;  %1218 = vst [vmem:[%s2168_s6 + $0x10] sm:$0xff] %v1202_v62 }
 0x449   : > { %v1189_v1 = vmul.f32 0.6931472, %v1625_v63 }
 0x44a   : > { %v1155_v4 = vpop.xlane.xlu1 %1154  ;;  %v1149_v5 = vpop.xlane.xlu0 %1148  ;;  %v1203_v7 = vsub.f32 %v2042_v53, %v1175_v0 }
 0x44b   : > { %1634 = vlog2.f32 %v1155_v4  ;;  %v1627_v8 = vpop.eup %1626  ;;  %v1210_v10 = vsub.f32 %v2039_v49, %v1189_v1 }
 0x44c   : > { %1636 = vlog2.f32 %v1149_v5  ;;  %v1629_v15 = vpop.eup %1628  ;;  %1219 = vst [vmem:[%s2168_s6 + $0x18] sm:$0xff] %v1203_v7  ;;  %v1191_v48 = vmul.f32 0.6931472, %v1627_v8 }
 0x44d   : > { %1226 = vst [vmem:[%s2168_s6 + $0x50] sm:$0xff] %v1210_v10  ;;  %v1169_v16 = vmul.f32 0.6931472, %v1629_v15 }
 0x44e   : > { %v1151_v17 = vpop.xlane.xlu1 %1150  ;;  %v1145_v19 = vpop.xlane.xlu0 %1144  ;;  %v1211_v53 = vsub.f32 %v2048_v59, %v1191_v48 }
 0x44f   : > { %1638 = vlog2.f32 %v1151_v17  ;;  %v1200_v20 = vsub.f32 %v2045_v55, %v1169_v16 }
 0x450   : > { %1640 = vlog2.f32 %v1145_v19  ;;  %1227 = vst [vmem:[%s2168_s6 + $0x58] sm:$0xff] %v1211_v53 }
 0x451   : > { %v1631_v49 = vpop.eup %1630  ;;  %1216 = vst [vmem:[%s2168_s6] sm:$0xff] %v1200_v20 }
 0x452   : > { %v1633_v22 = vpop.eup %1632  ;;  %v1171_v27 = vmul.f32 0.6931472, %v1631_v49  ;;  %v1147_v28 = vpop.xlane.xlu1 %1146 }
 0x453   : > { %v1161_v29 = vpop.xlane.xlu0 %1160  ;;  %v1185_v31 = vmul.f32 0.6931472, %v1633_v22  ;;  %1642 = vlog2.f32 %v1147_v28 }
 0x454   : > { %v1201_v59 = vsub.f32 %v2057_v3, %v1171_v27  ;;  %1644 = vlog2.f32 %v1161_v29 }
 0x455   : > { %v1635_v55 = vpop.eup %1634  ;;  %v1208_v32 = vsub.f32 %v2050_v60, %v1185_v31 }
 0x456   : > { %v1637_v34 = vpop.eup %1636  ;;  %1217 = vst [vmem:[%s2168_s6 + $0x8] sm:$0xff] %v1201_v59  ;;  %v1187_v39 = vmul.f32 0.6931472, %v1635_v55  ;;  %v1163_v40 = vpop.xlane.xlu1 %1162 }
 0x457   : > { %v1165_v41 = vpop.xlane.xlu0 %1164  ;;  %1224 = vst [vmem:[%s2168_s6 + $0x40] sm:$0xff] %v1208_v32  ;;  %v1181_v9 = vmul.f32 0.6931472, %v1637_v34  ;;  %1646 = vlog2.f32 %v1163_v40 }
 0x458   : > { %v1209_v3 = vsub.f32 %v2055_v2, %v1187_v39  ;;  %1648 = vlog2.f32 %v1165_v41 }
 0x459   : > { %v1639_v6 = vpop.eup %1638  ;;  %v1206_v60 = vsub.f32 %v2063_v14, %v1181_v9 }
 0x45a   : > { %v1641_v11 = vpop.eup %1640  ;;  %1225 = vst [vmem:[%s2168_s6 + $0x48] sm:$0xff] %v1209_v3  ;;  %v1183_v18 = vmul.f32 0.6931472, %v1639_v6  ;;  %v1167_v23 = vpop.xlane.xlu1 %1166 }
 0x45b   : > { %1222 = vst [vmem:[%s2168_s6 + $0x30] sm:$0xff] %v1206_v60  ;;  %v1177_v24 = vmul.f32 0.6931472, %v1641_v11  ;;  %1650 = vlog2.f32 %v1167_v23 }
 0x45c   : > { %v1207_v33 = vsub.f32 %v2061_v13, %v1183_v18 }
 0x45d   : > { %v1643_v2 = vpop.eup %1642  ;;  %v1204_v30 = vsub.f32 %v2069_v26, %v1177_v24 }
 0x45e   : > { %v1645_v36 = vpop.eup %1644  ;;  %1223 = vst [vmem:[%s2168_s6 + $0x38] sm:$0xff] %v1207_v33  ;;  %v1179_v14 = vmul.f32 0.6931472, %v1643_v2 }
 0x45f   : > { %1220 = vst [vmem:[%s2168_s6 + $0x20] sm:$0xff] %v1204_v30  ;;  %v1193_v35 = vmul.f32 0.6931472, %v1645_v36 }
 0x460   : > { %v1205_v43 = vsub.f32 %v2067_v25, %v1179_v14 }
 0x461   : > { %v1647_v44 = vpop.eup %1646  ;;  %v1212_v42 = vsub.f32 %v2077_v38, %v1193_v35 }
 0x462   : > { %v1649_v13 = vpop.eup %1648  ;;  %1221 = vst [vmem:[%s2168_s6 + $0x28] sm:$0xff] %v1205_v43  ;;  %v1195_v26 = vmul.f32 0.6931472, %v1647_v44 }
 0x463   : > { %1228 = vst [vmem:[%s2168_s6 + $0x60] sm:$0xff] %v1212_v42  ;;  %v1197_v45 = vmul.f32 0.6931472, %v1649_v13 }
 0x464   : > { %v1213_v46 = vsub.f32 %v2074_v37, %v1195_v26 }
 0x465   : > { %v1651_v47 = vpop.eup %1650  ;;  %v1214_v50 = vsub.f32 %v2082_v12, %v1197_v45 }
 0x466   : > { %1229 = vst [vmem:[%s2168_s6 + $0x68] sm:$0xff] %v1213_v46  ;;  %v1199_v25 = vmul.f32 0.6931472, %v1651_v47 }
 0x467   : > { %1230 = vst [vmem:[%s2168_s6 + $0x70] sm:$0xff] %v1214_v50 }
 0x468   : > { %v1215_v38 = vsub.f32 %v2085_v21, %v1199_v25 }
 0x46a   : > { %1231 = vst [vmem:[%s2168_s6 + $0x78] sm:$0xff] %v1215_v38 }
 0x46b PF: > { %s16_s23 = sadd.s32 1, %s1674_s23   ;;  %s2171_s21 = smov %s1670_s22 }
 0x46c   : > { %p13_p10 = scmp.ge.s32.totalorder %s16_s23, 5   ;;  %s2172_s22 = smov %s2174_s24 }
 0x46e   :  { %15 = sbr.rel (!%p13_p10) target bundleno = 2 (0x2), region = 102 }

</bundles_post_ra>
